<compile_context>
chip_gen: v5e
topology: v5e:2x2
jax: 0.10.0
libtpu: 0.0.40
codegen_flags: <defaults>
</compile_context>

<pallas_src>
import functools

import jax
import jax.numpy as jnp
from jax import lax
from jax.experimental import pallas as pl
from jax.experimental.pallas import tpu as pltpu

MARGIN1 = 0.6
MARGIN2 = 0.1


def _round_up(x, m):
    return (x + m - 1) // m * m


def _finalize_rows(pos, diag, tot, wp_with, nz_with, inv_bs, margin1, margin2):
    """Per-row hinge terms from the accumulated row sums (all (tm, 1) f32)."""
    neg_mean = (tot - wp_with) * inv_bs          # different-label sum / bs
    wp_mean = (wp_with - diag) * inv_bs          # same-label, diag excluded / bs
    nz = nz_with - (diag != 0.0).astype(jnp.float32)
    h1 = jnp.maximum(pos - neg_mean + margin1, 0.0)
    h2 = jnp.maximum(pos - wp_mean + margin2, 0.0)
    has = nz > 0.0
    return h1, jnp.where(has, h2, 0.0), has.astype(jnp.float32)


# ---------------------------------------------------------------------------
# Fast path: normalized text matrix resident in VMEM, 1-D grid over row tiles
# ---------------------------------------------------------------------------
def _resident_kernel(lab_r_ref, lab_c_ref, pos_ref, diag_ref, img_ref,
                     txt_t_ref, h1_ref, h2_ref, rh_ref,
                     *, bs, n_pad, margin1, margin2):
    sim = lax.dot_general(img_ref[...], txt_t_ref[...],
                          (((1,), (0,)), ((), ())),
                          preferred_element_type=jnp.float32)   # (tm, bs_p)
    dist = 1.0 - sim
    same = lab_r_ref[...] == lab_c_ref[...]                     # (tm, bs_p)
    wp_d = jnp.where(same, dist, 0.0)

    # Padded text rows are exactly zero -> sim == 0, dist == 1: subtract the
    # static pad contribution instead of masking every column.
    tot = jnp.sum(dist, axis=1, keepdims=True) - float(n_pad)
    wp = jnp.sum(wp_d, axis=1, keepdims=True)
    nzc = jnp.sum((wp_d != 0.0).astype(jnp.float32), axis=1, keepdims=True)

    h1, h2, rh = _finalize_rows(pos_ref[...], diag_ref[...], tot, wp, nzc,
                                1.0 / float(bs), margin1, margin2)
    h1_ref[...] = h1
    h2_ref[...] = h2
    rh_ref[...] = rh


# ---------------------------------------------------------------------------
# Fallback: 2-D streaming grid (row tiles parallel, column tiles = reduction)
# ---------------------------------------------------------------------------
def _streaming_kernel(lab_r_ref, lab_c_ref, pos_ref, diag_ref, img_ref,
                      txt_t_ref, h1_ref, h2_ref, rh_ref,
                      tot_sc, wp_sc, nz_sc,
                      *, bs, n_pad, margin1, margin2):
    j = pl.program_id(1)

    @pl.when(j == 0)
    def _init():
        tot_sc[...] = jnp.zeros_like(tot_sc)
        wp_sc[...] = jnp.zeros_like(wp_sc)
        nz_sc[...] = jnp.zeros_like(nz_sc)

    sim = lax.dot_general(img_ref[...], txt_t_ref[...],
                          (((1,), (0,)), ((), ())),
                          preferred_element_type=jnp.float32)   # (tm, tn)
    dist = 1.0 - sim
    same = lab_r_ref[...] == lab_c_ref[...]
    wp_d = jnp.where(same, dist, 0.0)

    tot_sc[...] += jnp.sum(dist, axis=1, keepdims=True)
    wp_sc[...] += jnp.sum(wp_d, axis=1, keepdims=True)
    nz_sc[...] += jnp.sum((wp_d != 0.0).astype(jnp.float32), axis=1,
                          keepdims=True)

    @pl.when(j == pl.num_programs(1) - 1)
    def _fin():
        h1, h2, rh = _finalize_rows(pos_ref[...], diag_ref[...],
                                    tot_sc[...] - float(n_pad),
                                    wp_sc[...], nz_sc[...],
                                    1.0 / float(bs), margin1, margin2)
        h1_ref[...] = h1
        h2_ref[...] = h2
        rh_ref[...] = rh


def all_triplets_loss(labels, img_embs, text_embs, margin1=MARGIN1,
                      margin2=MARGIN2, mxu_dtype=jnp.bfloat16,
                      block_m=256, block_n=512,
                      resident_text_bytes=8 << 20, resident_max_cols=4096):
    bs, d = img_embs.shape
    ib = jnp.dtype(mxu_dtype).itemsize

    # ---- one-pass XLA prologue: O(bs*d), negligible vs the O(bs^2*d) kernel ----
    img = img_embs.astype(jnp.float32)
    txt = text_embs.astype(jnp.float32)
    img_ss = jnp.sum(img * img, axis=1, keepdims=True)
    txt_ss = jnp.sum(txt * txt, axis=1, keepdims=True)
    dot_it = jnp.sum(img * txt, axis=1, keepdims=True)
    # pos_dist = 1 - cosine_similarity (torch eps = 1e-8), exact f32
    pos = 1.0 - dot_it / jnp.maximum(jnp.sqrt(img_ss) * jnp.sqrt(txt_ss), 1e-8)
    # F.normalize (torch eps = 1e-12); cast to the MXU streaming dtype
    img_n = (img * lax.rsqrt(jnp.maximum(img_ss, 1e-24))).astype(mxu_dtype)
    txt_n = (txt * lax.rsqrt(jnp.maximum(txt_ss, 1e-24))).astype(mxu_dtype)
    # Diagonal of all_dist computed from the *cast* operands so it is
    # consistent with the MXU-derived row sums inside the kernel.
    diag = 1.0 - jnp.sum(img_n.astype(jnp.float32) * txt_n.astype(jnp.float32),
                         axis=1, keepdims=True)
    labels_i32 = labels.astype(jnp.int32)

    # ---- tile selection / padding ----
    assert block_m % 8 == 0 and block_n % 128 == 0
    assert block_m & (block_m - 1) == 0 and block_n & (block_n - 1) == 0

    use_resident = (bs <= resident_max_cols
                    and bs * d * ib <= resident_text_bytes)

    if use_resident:
        if bs <= block_m:
            tm = _round_up(bs, 8)
        else:
            tm = block_m
            # Shrink the row tile until padding waste <= bs/8 (tight padding;
            # also keeps n_i >= 2 for v7x megacore on moderate batches).
            while tm > 64 and (_round_up(bs, tm) - bs) * 8 > bs:
                tm //= 2
        tn = None
        bs_p = _round_up(bs, tm)
        est = ((2 * tm * d + 2 * d * bs_p) * ib + 4 * tm * bs_p * 4
               + 8 * bs_p + 64 * tm)
    else:
        tm, tn = block_m, block_n

        def _est(tm_, tn_):
            return ((2 * tm_ * d + 2 * d * tn_) * ib + 3 * tm_ * tn_ * 4
                    + 8 * tn_ + 64 * tm_)

        while _est(tm, tn) > (40 << 20) and (tn > 128 or tm > 64):
            if tn > 128:
                tn //= 2
            else:
                tm //= 2
        bs_p = _round_up(bs, max(tm, tn))   # tm | tn (powers of two) -> no lcm blow-up
        est = _est(tm, tn)

    # Footprint-derived VMEM budget, capped at 48 MiB for v7x headroom.
    vmem_limit = int(min(max(est + (8 << 20), 32 << 20), 48 << 20))

    pad = bs_p - bs
    if pad:
        img_n = jnp.pad(img_n, ((0, pad), (0, 0)))
        txt_n = jnp.pad(txt_n, ((0, pad), (0, 0)))
        pos = jnp.pad(pos, ((0, pad), (0, 0)))
        diag = jnp.pad(diag, ((0, pad), (0, 0)))
        # Sentinel label (min-1) can never equal a real label, so padded
        # columns never join the weak-positive mask; padded rows are simply
        # sliced off in the epilogue.
        sentinel = jnp.min(labels_i32) - 1
        lab = jnp.concatenate([labels_i32, jnp.broadcast_to(sentinel, (pad,))])
    else:
        lab = labels_i32

    txt_t = txt_n.T                          # (d, bs_p): K-major MXU RHS
    row_labels = lab.reshape(bs_p, 1)
    col_labels = lab.reshape(1, bs_p)

    out_shape = (jax.ShapeDtypeStruct((bs_p, 1), jnp.float32),) * 3

    if use_resident:
        kernel = functools.partial(_resident_kernel, bs=bs, n_pad=pad,
                                   margin1=float(margin1),
                                   margin2=float(margin2))
        row_spec = pl.BlockSpec((tm, 1), lambda i: (i, 0))
        h1, h2, rh = pl.pallas_call(
            kernel,
            grid=(bs_p // tm,),
            in_specs=[
                row_spec,                                    # row labels
                pl.BlockSpec((1, bs_p), lambda i: (0, 0)),   # col labels (resident)
                row_spec,                                    # pos_dist
                row_spec,                                    # diag of all_dist
                pl.BlockSpec((tm, d), lambda i: (i, 0)),     # normalized img rows
                pl.BlockSpec((d, bs_p), lambda i: (0, 0)),   # normalized text (resident)
            ],
            out_specs=(row_spec,) * 3,
            out_shape=out_shape,
            compiler_params=pltpu.CompilerParams(
                dimension_semantics=("parallel",),
                vmem_limit_bytes=vmem_limit),
        )(row_labels, col_labels, pos, diag, img_n, txt_t)
    else:
        kernel = functools.partial(_streaming_kernel, bs=bs, n_pad=pad,
                                   margin1=float(margin1),
                                   margin2=float(margin2))
        row_spec = pl.BlockSpec((tm, 1), lambda i, j: (i, 0))
        h1, h2, rh = pl.pallas_call(
            kernel,
            grid=(bs_p // tm, bs_p // tn),
            in_specs=[
                row_spec,                                    # row labels
                pl.BlockSpec((1, tn), lambda i, j: (0, j)),  # col labels
                row_spec,                                    # pos_dist
                row_spec,                                    # diag of all_dist
                pl.BlockSpec((tm, d), lambda i, j: (i, 0)),  # img rows
                pl.BlockSpec((d, tn), lambda i, j: (0, j)),  # text cols (K-major)
            ],
            out_specs=(row_spec,) * 3,
            out_shape=out_shape,
            scratch_shapes=[pltpu.VMEM((tm, 1), jnp.float32)] * 3,
            compiler_params=pltpu.CompilerParams(
                dimension_semantics=("parallel", "arbitrary"),
                vmem_limit_bytes=vmem_limit),
        )(row_labels, col_labels, pos, diag, img_n, txt_t)

    # ---- tiny O(bs) JAX epilogue (handles torch's data-dependent nz branch) ----
    h1v, h2v, rhv = h1[:bs, 0], h2[:bs, 0], rh[:bs, 0]
    neg_loss = jnp.sum(h1v) / bs
    cnt = jnp.sum(rhv)
    wp_loss = jnp.sum(h2v) / jnp.maximum(cnt, 1.0)
    return jnp.where(cnt > 0.0, neg_loss + 0.1 * wp_loss, neg_loss)


def all_triplets_loss_ref(labels, img_embs, text_embs,
                          margin1=MARGIN1, margin2=MARGIN2):
    # Pure-JAX reference mirroring the PyTorch forward.
    bs = img_embs.shape[0]
    img = img_embs.astype(jnp.float32)
    txt = text_embs.astype(jnp.float32)
    img_len = jnp.linalg.norm(img, axis=1)
    txt_len = jnp.linalg.norm(txt, axis=1)
    cos = jnp.sum(img * txt, axis=1) / jnp.maximum(img_len * txt_len, 1e-8)
    pos_dist = 1.0 - cos
    img_n = img / jnp.maximum(img_len, 1e-12)[:, None]
    txt_n = txt / jnp.maximum(txt_len, 1e-12)[:, None]
    all_dist = 1.0 - jnp.matmul(img_n, txt_n.T,
                                precision=jax.lax.Precision.HIGHEST)
    same = labels[:, None] == labels[None, :]
    neg_mask = (~same).astype(jnp.float32)
    wp_mask = (same & ~jnp.eye(bs, dtype=bool)).astype(jnp.float32)
    neg_dist = jnp.mean(all_dist * neg_mask, axis=1)
    neg_loss = jnp.mean(jnp.maximum(pos_dist - neg_dist + margin1, 0.0))
    wp_dist = all_dist * wp_mask
    nz = jnp.sum(wp_dist != 0.0, axis=1)
    row_has = nz != 0
    wp_mean = jnp.mean(wp_dist, axis=1)
    hinge2 = jnp.maximum(pos_dist - wp_mean + margin2, 0.0)
    cnt = jnp.sum(row_has)
    wp_loss = jnp.sum(jnp.where(row_has, hinge2, 0.0)) / jnp.maximum(cnt, 1)
    return jnp.where(cnt > 0, neg_loss + 0.1 * wp_loss, neg_loss)


if __name__ == "__main__":
    key = jax.random.PRNGKey(0)
    k1, k2, k3, k4, k5, k6 = jax.random.split(key, 6)

    # --- small single-tile case (resident path, one row tile) ---
    bs, dim = 8, 32
    labels = jax.random.randint(k1, (bs,), 0, 3, dtype=jnp.int32)
    img_embs = jax.random.normal(k2, (bs, dim), dtype=jnp.float32)
    text_embs = jax.random.normal(k3, (bs, dim), dtype=jnp.float32)
    ref = all_triplets_loss_ref(labels, img_embs, text_embs)

    out_f32 = jax.block_until_ready(
        all_triplets_loss(labels, img_embs, text_embs, mxu_dtype=jnp.float32))
    assert jnp.allclose(out_f32, ref, rtol=1e-3, atol=1e-4), (out_f32, ref)

    out_bf16 = jax.block_until_ready(
        all_triplets_loss(labels, img_embs, text_embs))   # bf16-MXU default
    assert jnp.allclose(out_bf16, ref, rtol=5e-2, atol=1e-2), (out_bf16, ref)

    # --- resident multi-row-tile path with padding: bs=600 -> tm=128, bs_p=640 ---
    bs2, dim2 = 600, 256
    labels2 = jax.random.randint(k4, (bs2,), 0, 5, dtype=jnp.int32)
    img2 = jax.random.normal(k5, (bs2, dim2), dtype=jnp.float32)
    txt2 = jax.random.normal(k6, (bs2, dim2), dtype=jnp.float32)
    ref2 = all_triplets_loss_ref(labels2, img2, txt2)

    out2_bf16 = jax.block_until_ready(all_triplets_loss(labels2, img2, txt2))
    assert jnp.allclose(out2_bf16, ref2, rtol=5e-2, atol=1e-2), (out2_bf16, ref2)

    out2_f32 = jax.block_until_ready(
        all_triplets_loss(labels2, img2, txt2, mxu_dtype=jnp.float32))
    assert jnp.allclose(out2_f32, ref2, rtol=1e-3, atol=1e-4), (out2_f32, ref2)

    # --- forced 2-D streaming fallback: bs_p=1024, grid (4, 2), padded last col tile ---
    out3_f32 = jax.block_until_ready(
        all_triplets_loss(labels2, img2, txt2, mxu_dtype=jnp.float32,
                          resident_text_bytes=0))
    assert jnp.allclose(out3_f32, ref2, rtol=1e-3, atol=1e-4), (out3_f32, ref2)

    out3_bf16 = jax.block_until_ready(
        all_triplets_loss(labels2, img2, txt2, resident_text_bytes=0))
    assert jnp.allclose(out3_bf16, ref2, rtol=5e-2, atol=1e-2), (out3_bf16, ref2)

    print("KERNEL_OK")
</pallas_src>

<mosaic_0001>
module attributes {stable_mosaic.version = 11 : i64} {
  func.func @_resident_kernel(%arg0: i32, %arg1: memref<8x1xi32, #tpu.memory_space<vmem>>, %arg2: memref<1x8xi32, #tpu.memory_space<vmem>>, %arg3: memref<8x1xf32, #tpu.memory_space<vmem>>, %arg4: memref<8x1xf32, #tpu.memory_space<vmem>>, %arg5: memref<8x32xf32, #tpu.memory_space<vmem>>, %arg6: memref<32x8xf32, #tpu.memory_space<vmem>>, %arg7: memref<8x1xf32, #tpu.memory_space<vmem>>, %arg8: memref<8x1xf32, #tpu.memory_space<vmem>>, %arg9: memref<8x1xf32, #tpu.memory_space<vmem>>) attributes {dimension_semantics = [#tpu.dimension_semantics<parallel>], iteration_bounds = array<i64: 1>, scalar_prefetch = 0 : i64, scratch_operands = 0 : i64, tpu.core_type = #tpu.core_type<tc>, window_params = [{transform_indices = @transform_0, window_bounds = array<i64: 8, 1>}, {pipeline_mode = #tpu.pipeline_mode<synchronous>, transform_indices = @transform_1, window_bounds = array<i64: 1, 8>}, {transform_indices = @transform_2, window_bounds = array<i64: 8, 1>}, {transform_indices = @transform_3, window_bounds = array<i64: 8, 1>}, {transform_indices = @transform_4, window_bounds = array<i64: 8, 32>}, {pipeline_mode = #tpu.pipeline_mode<synchronous>, transform_indices = @transform_5, window_bounds = array<i64: 32, 8>}, {transform_indices = @transform_6, window_bounds = array<i64: 8, 1>}, {transform_indices = @transform_7, window_bounds = array<i64: 8, 1>}, {transform_indices = @transform_8, window_bounds = array<i64: 8, 1>}]} {
    %c0 = arith.constant 0 : index
    %c0_0 = arith.constant 0 : index
    %0 = vector.load %arg5[%c0, %c0_0] : memref<8x32xf32, #tpu.memory_space<vmem>>, vector<8x32xf32>
    %c0_1 = arith.constant 0 : index
    %c0_2 = arith.constant 0 : index
    %1 = vector.load %arg6[%c0_1, %c0_2] : memref<32x8xf32, #tpu.memory_space<vmem>>, vector<32x8xf32>
    %cst = arith.constant dense<0.000000e+00> : vector<8x8xf32>
    %2 = tpu.matmul %0, %1, %cst {dimension_numbers = #tpu.dot_dimension_numbers<[1], [0], [0], [1], [0, 0, 1, 1], [], []>} : vector<8x32xf32>, vector<32x8xf32>, vector<8x8xf32> -> vector<8x8xf32>
    %cst_3 = arith.constant 1.000000e+00 : f32
    %3 = vector.broadcast %cst_3 : f32 to vector<8x8xf32>
    %4 = arith.subf %3, %2 : vector<8x8xf32>
    %c0_4 = arith.constant 0 : index
    %c0_5 = arith.constant 0 : index
    %5 = vector.load %arg1[%c0_4, %c0_5] : memref<8x1xi32, #tpu.memory_space<vmem>>, vector<8x1xi32>
    %c0_6 = arith.constant 0 : index
    %c0_7 = arith.constant 0 : index
    %6 = vector.load %arg2[%c0_6, %c0_7] : memref<1x8xi32, #tpu.memory_space<vmem>>, vector<1x8xi32>
    %7 = vector.broadcast %5 : vector<8x1xi32> to vector<8x8xi32>
    %8 = vector.broadcast %6 : vector<1x8xi32> to vector<8x8xi32>
    %9 = arith.cmpi eq, %7, %8 : vector<8x8xi32>
    %cst_8 = arith.constant 0.000000e+00 : f32
    %10 = vector.broadcast %cst_8 : f32 to vector<8x8xf32>
    %11 = arith.select %9, %4, %10 : vector<8x8xi1>, vector<8x8xf32>
    %cst_9 = arith.constant dense<0.000000e+00> : vector<8xf32>
    %12 = vector.multi_reduction <add>, %4, %cst_9 [1] : vector<8x8xf32> to vector<8xf32>
    %13 = vector.shape_cast %12 : vector<8xf32> to vector<8x1xf32>
    %cst_10 = arith.constant 0.000000e+00 : f32
    %14 = vector.broadcast %cst_10 : f32 to vector<8x1xf32>
    %15 = arith.subf %13, %14 : vector<8x1xf32>
    %cst_11 = arith.constant dense<0.000000e+00> : vector<8xf32>
    %16 = vector.multi_reduction <add>, %11, %cst_11 [1] : vector<8x8xf32> to vector<8xf32>
    %17 = vector.shape_cast %16 : vector<8xf32> to vector<8x1xf32>
    %cst_12 = arith.constant 0.000000e+00 : f32
    %18 = vector.broadcast %cst_12 : f32 to vector<8x8xf32>
    %19 = arith.cmpf one, %11, %18 : vector<8x8xf32>
    %20 = arith.extui %19 : vector<8x8xi1> to vector<8x8xi32>
    %21 = arith.sitofp %20 : vector<8x8xi32> to vector<8x8xf32>
    %cst_13 = arith.constant dense<0.000000e+00> : vector<8xf32>
    %22 = vector.multi_reduction <add>, %21, %cst_13 [1] : vector<8x8xf32> to vector<8xf32>
    %23 = vector.shape_cast %22 : vector<8xf32> to vector<8x1xf32>
    %c0_14 = arith.constant 0 : index
    %c0_15 = arith.constant 0 : index
    %24 = vector.load %arg3[%c0_14, %c0_15] : memref<8x1xf32, #tpu.memory_space<vmem>>, vector<8x1xf32>
    %c0_16 = arith.constant 0 : index
    %c0_17 = arith.constant 0 : index
    %25 = vector.load %arg4[%c0_16, %c0_17] : memref<8x1xf32, #tpu.memory_space<vmem>>, vector<8x1xf32>
    %26 = arith.subf %15, %17 : vector<8x1xf32>
    %cst_18 = arith.constant 1.250000e-01 : f32
    %27 = vector.broadcast %cst_18 : f32 to vector<8x1xf32>
    %28 = arith.mulf %26, %27 : vector<8x1xf32>
    %29 = arith.subf %17, %25 : vector<8x1xf32>
    %cst_19 = arith.constant 1.250000e-01 : f32
    %30 = vector.broadcast %cst_19 : f32 to vector<8x1xf32>
    %31 = arith.mulf %29, %30 : vector<8x1xf32>
    %cst_20 = arith.constant 0.000000e+00 : f32
    %32 = vector.broadcast %cst_20 : f32 to vector<8x1xf32>
    %33 = arith.cmpf one, %25, %32 : vector<8x1xf32>
    %34 = arith.extui %33 : vector<8x1xi1> to vector<8x1xi32>
    %35 = arith.sitofp %34 : vector<8x1xi32> to vector<8x1xf32>
    %36 = arith.subf %23, %35 : vector<8x1xf32>
    %37 = arith.subf %24, %28 : vector<8x1xf32>
    %cst_21 = arith.constant 6.000000e-01 : f32
    %38 = vector.broadcast %cst_21 : f32 to vector<8x1xf32>
    %39 = arith.addf %37, %38 : vector<8x1xf32>
    %cst_22 = arith.constant 0.000000e+00 : f32
    %40 = vector.broadcast %cst_22 : f32 to vector<8x1xf32>
    %41 = arith.maximumf %39, %40 : vector<8x1xf32>
    %42 = arith.subf %24, %31 : vector<8x1xf32>
    %cst_23 = arith.constant 1.000000e-01 : f32
    %43 = vector.broadcast %cst_23 : f32 to vector<8x1xf32>
    %44 = arith.addf %42, %43 : vector<8x1xf32>
    %cst_24 = arith.constant 0.000000e+00 : f32
    %45 = vector.broadcast %cst_24 : f32 to vector<8x1xf32>
    %46 = arith.maximumf %44, %45 : vector<8x1xf32>
    %cst_25 = arith.constant 0.000000e+00 : f32
    %47 = vector.broadcast %cst_25 : f32 to vector<8x1xf32>
    %48 = arith.cmpf ogt, %36, %47 : vector<8x1xf32>
    %cst_26 = arith.constant 0.000000e+00 : f32
    %49 = vector.broadcast %cst_26 : f32 to vector<8x1xf32>
    %50 = arith.select %48, %46, %49 : vector<8x1xi1>, vector<8x1xf32>
    %51 = arith.extui %48 : vector<8x1xi1> to vector<8x1xi32>
    %52 = arith.sitofp %51 : vector<8x1xi32> to vector<8x1xf32>
    %c0_27 = arith.constant 0 : index
    %c0_28 = arith.constant 0 : index
    %53 = vector.load %arg7[%c0_27, %c0_28] : memref<8x1xf32, #tpu.memory_space<vmem>>, vector<8x1xf32>
    tpu.vector_store %arg7[%c0_27, %c0_28], %41 {strides = array<i32>} : memref<8x1xf32, #tpu.memory_space<vmem>>, vector<8x1xf32>,
    %c0_29 = arith.constant 0 : index
    %c0_30 = arith.constant 0 : index
    %54 = vector.load %arg8[%c0_29, %c0_30] : memref<8x1xf32, #tpu.memory_space<vmem>>, vector<8x1xf32>
    tpu.vector_store %arg8[%c0_29, %c0_30], %50 {strides = array<i32>} : memref<8x1xf32, #tpu.memory_space<vmem>>, vector<8x1xf32>,
    %c0_31 = arith.constant 0 : index
    %c0_32 = arith.constant 0 : index
    %55 = vector.load %arg9[%c0_31, %c0_32] : memref<8x1xf32, #tpu.memory_space<vmem>>, vector<8x1xf32>
    tpu.vector_store %arg9[%c0_31, %c0_32], %52 {strides = array<i32>} : memref<8x1xf32, #tpu.memory_space<vmem>>, vector<8x1xf32>,
    return
  }
  func.func @transform_0(%arg0: i32) -> (i32, i32) {
    %c0_i32 = arith.constant 0 : i32
    %c0_i32_0 = arith.constant 0 : i32
    return %arg0, %c0_i32 : i32, i32
  }
  func.func @transform_1(%arg0: i32) -> (i32, i32) {
    %c0_i32 = arith.constant 0 : i32
    %c0_i32_0 = arith.constant 0 : i32
    %c0_i32_1 = arith.constant 0 : i32
    return %c0_i32, %c0_i32_0 : i32, i32
  }
  func.func @transform_2(%arg0: i32) -> (i32, i32) {
    %c0_i32 = arith.constant 0 : i32
    %c0_i32_0 = arith.constant 0 : i32
    return %arg0, %c0_i32 : i32, i32
  }
  func.func @transform_3(%arg0: i32) -> (i32, i32) {
    %c0_i32 = arith.constant 0 : i32
    %c0_i32_0 = arith.constant 0 : i32
    return %arg0, %c0_i32 : i32, i32
  }
  func.func @transform_4(%arg0: i32) -> (i32, i32) {
    %c0_i32 = arith.constant 0 : i32
    %c0_i32_0 = arith.constant 0 : i32
    return %arg0, %c0_i32 : i32, i32
  }
  func.func @transform_5(%arg0: i32) -> (i32, i32) {
    %c0_i32 = arith.constant 0 : i32
    %c0_i32_0 = arith.constant 0 : i32
    %c0_i32_1 = arith.constant 0 : i32
    return %c0_i32, %c0_i32_0 : i32, i32
  }
  func.func @transform_6(%arg0: i32) -> (i32, i32) {
    %c0_i32 = arith.constant 0 : i32
    %c0_i32_0 = arith.constant 0 : i32
    return %arg0, %c0_i32 : i32, i32
  }
  func.func @transform_7(%arg0: i32) -> (i32, i32) {
    %c0_i32 = arith.constant 0 : i32
    %c0_i32_0 = arith.constant 0 : i32
    return %arg0, %c0_i32 : i32, i32
  }
  func.func @transform_8(%arg0: i32) -> (i32, i32) {
    %c0_i32 = arith.constant 0 : i32
    %c0_i32_0 = arith.constant 0 : i32
    return %arg0, %c0_i32 : i32, i32
  }
}

</mosaic_0001>

<bundles_post_ra>
// kernel: tpu_custom_call.1
= control target key start
LH: loop header
LB: loop body
LE: loop exit
PB: predicated region body
PF: predicated region fallthrough
CT: control target
= control target key end

     0   :  { %v121_v2 = vmov 0   ;;  %vm31_vm0 = vcmask 261120   ;;  %vm64_vm2 = vcmask 64512   ;;  %v122_v14 = vmov 0.0   ;;  %s204_s5 = inlined_call_operand.vmem [shape: f32[32,8], index: 5, kind: input, shape index: {}]   ;;  %s205_s0 = inlined_call_operand.vmem [shape: s32[8,1], index: 0, kind: input, shape index: {}]   ;;  %s206_s4 = inlined_call_operand.vmem [shape: f32[8,32], index: 4, kind: input, shape index: {}]   ;;  %s207_s1 = inlined_call_operand.vmem [shape: s32[1,8], index: 1, kind: input, shape index: {}]   ;;  %s208_s3 = inlined_call_operand.vmem [shape: f32[8,1], index: 3, kind: input, shape index: {}]   ;;  %s209_s2 = inlined_call_operand.vmem [shape: f32[8,1], index: 2, kind: input, shape index: {}]   ;;  %s210_s6 = inlined_call_operand.vmem [shape: f32[8,1], index: 6, kind: output, shape index: {0}]   ;;  %s211_s7 = inlined_call_operand.vmem [shape: f32[8,1], index: 7, kind: output, shape index: {1}]   ;;  %s212_s8 = inlined_call_operand.vmem [shape: f32[8,1], index: 8, kind: output, shape index: {2}]  }
   0x1   :  { %v30_v0 = vld [vmem:[%s204_s5 + $0x18] sm:$0xff]  ;;  %v29_v1 = vld [vmem:[%s204_s5 + $0x10] sm:$0xff]  ;;  %119 = vset.pattern.permute.xlu0 %v121_v2  ;;  %v56_v3 = vld [vmem:[%s205_s0] sm:$0xff]  ;;  %vm97_vm5 = vcmask 7168  }
   0x2   :  { %47 = vmatpush.msra.mxu0 %v30_v0  ;;  %v28_v4 = vld [vmem:[%s204_s5 + $0x8] sm:$0xff]  ;;  %59 = vperm.xlu0 %119, %v56_v3   ;;  %v27_v5 = vld [vmem:[%s204_s5] sm:$0xff] }
   0x3   :  { %v26_v6 = vld [vmem:[%s206_s4] sm:$0xff] }
   0x4   :  { %48 = vmatpush.msra.mxu0 %v29_v1  ;;  %v120_v7 = vld [vmem:[%s207_s1] ss:$0 sm:$0xff] }
   0x5   :  { %v78_v17 = vld [vmem:[%s208_s3] sm:$0xff] }
   0x6   :  { %49 = vmatpush.msra.mxu0 %v28_v4  ;;  %v77_v22 = vld [vmem:[%s209_s2] sm:$0xff]  ;;  %vm83_vm4 = vcmp.ne.f32.partialorder %v78_v17, 0.0 }
   0x7   :  { %v115_v27 = vsel %vm83_vm4, 1.0, %v122_v14 }
   0x8   :  { %50 = vmatpush.msra.mxu0 %v27_v5 }
   0x9   :  { %113 = vmatmul.msk.f32.vlgmr.msra.gmra.mxu0 %vm31_vm0, %v26_v6 }
  0x74   :  { %v60_v8 = vpop.permute.xlu0 %59 }
  0x75   :  { %vm62_vm1 = vcmp.eq.s32.totalorder %v60_v8, %v120_v7 }
  0x86   :  { %v52_v9 = vpop.f32.mrf.mxu0 }
  0x87   :  { %v55_v10 = vsub.f32 1.0, %v52_v9 }
  0x89   :  { %v65_v11 = vsel %vm64_vm2, %v55_v10, 0.0  ;;  %v63_v12 = vsel %vm62_vm1, %v55_v10, 0.0 }
  0x8a   :  { %66 = vadd.xlane.f32.xlu1 %v65_v11  ;;  %v68_v13 = vsel %vm64_vm2, %v63_v12, 0.0  ;;  %vm71_vm3 = vcmp.ne.f32.partialorder %v63_v12, 0.0 }
  0x8b   :  { %69 = vadd.xlane.f32.xlu0 %v68_v13  ;;  %v114_v15 = vsel %vm71_vm3, 1.0, %v122_v14 }
  0x8c   :  { %v74_v16 = vsel %vm64_vm2, %v114_v15, 0.0 }
  0x92   :  { %75 = vadd.xlane.f32.xlu1 %v74_v16 }
  0xfd   :  { %v67_v18 = vpop.xlane.xlu1 %66 }
  0xfe   :  { %v70_v19 = vpop.xlane.xlu0 %69 }
  0xff   :  { %v79_v20 = vsub.f32 %v67_v18, %v70_v19  ;;  %v81_v21 = vsub.f32 %v70_v19, %v78_v17 }
 0x101   :  { %v80_v23 = vmul.f32 0.125, %v79_v20  ;;  %v82_v24 = vmul.f32 0.125, %v81_v21 }
 0x103   :  { %v87_v25 = vsub.f32 %v77_v22, %v80_v23  ;;  %v90_v26 = vsub.f32 %v77_v22, %v82_v24 }
 0x105   :  { %v88_v28 = vadd.f32 0.6, %v87_v25  ;;  %v91_v29 = vadd.f32 0.1, %v90_v26  ;;  %v76_v30 = vpop.xlane.xlu1 %75 }
 0x106   :  { %v86_v31 = vsub.f32 %v76_v30, %v115_v27 }
 0x107   :  { %v89_v32 = vmax.f32 %v88_v28, 0.0  ;;  %v92_v33 = vmax.f32 %v91_v29, 0.0 }
 0x108   :  { %vm93_vm6 = vcmp.gt.f32.partialorder %v86_v31, 0.0 }
 0x109   :  { %v94_v34 = vsel %vm93_vm6, %v92_v33, 0.0  ;;  %v116_v35 = vsel %vm93_vm6, 1.0, %v122_v14  ;;  %98 = vst.msk [vmem:[%s210_s6] sm:$0xff] %vm97_vm5, %v89_v32 }
 0x10a   :  { %99 = vst.msk [vmem:[%s211_s7] sm:$0xff] %vm97_vm5, %v94_v34 }
 0x10b   :  { %100 = vst.msk [vmem:[%s212_s8] sm:$0xff] %vm97_vm5, %v116_v35 }

</bundles_post_ra>
